<compile_context>
chip_gen: v7x
topology: tpu7x:2x2x1
jax: 0.10.0
libtpu: 0.0.40
codegen_flags: <defaults>
</compile_context>

<pallas_src>
import functools

import jax
import jax.numpy as jnp
from jax import lax
from jax.experimental import pallas as pl
from jax.experimental.pallas import tpu as pltpu


def _round_up(x, m):
    return (x + m - 1) // m * m


# ----------------------------- Pallas kernel ---------------------------------
def _conv3x3_relu_chunk_kernel(x_ref, w_ref, b_ref, o_ref, *, wp, n_out):
    """One chunk of the wrapped Conv2d(3x3, pad=1) + ReLU model.

    x_ref : (1, Cin, Npad) bf16  zero-padded chunk activations, flattened so
                                 lane l = b*Hp*Wp + p*Wp + q (padded coords).
    w_ref : (9, Cout, Cin) bf16  per-tap conv weights, tap t = ky*3 + kx.
    b_ref : (Cout, 1)      f32   bias.
    o_ref : (Cout, Nout)   f32   lane-dense output; lane l = b*Hp*Wp + h*Wp + w.
    """
    # Fused im2col: 9 statically lane-shifted windows of the SAME resident
    # VMEM block (lane shifts go to the XLU slot, cheap vs MXU/vst),
    # accumulated in f32 on the MXU.  No expanded patches tensor in HBM.
    acc = None
    for t in range(9):
        off = (t // 3) * wp + (t % 3)            # tap lane offset ky*Wp + kx
        tap = jnp.dot(w_ref[t], x_ref[0, :, off:off + n_out],
                      preferred_element_type=jnp.float32)
        acc = tap if acc is None else acc + tap
    # f32 bias + ReLU epilogue.
    o_ref[...] = jnp.maximum(acc + b_ref[...], 0.0).astype(o_ref.dtype)


# ------------------------- AsyncPipelineModel.forward -------------------------
def async_pipeline_forward(x, w_hwio, bias, degree=2):
    """Mirror of AsyncPipelineModel.forward for the Tensor-input case.

    Chunks the batch along dim 0 into `degree` pieces, runs the wrapped model
    on every chunk (one grid step per chunk inside a single pallas_call), and
    returns the result of the LAST chunk, exactly as the torch module does.
    """
    if not isinstance(x, jnp.ndarray):
        # TODO(synk): the tuple branch of _slice_input in the original module
        # is effectively dead/buggy (`param is torch.Tensor`); only the Tensor
        # path is implemented here.
        raise ValueError("The type is not supported now.")

    B, Cin, H, W = x.shape
    if B % degree != 0:
        # TODO(synk): torch.chunk tolerates uneven chunks; only the evenly
        # divisible batch case is implemented here.
        raise ValueError("Batch must be divisible by degree.")
    Bc = B // degree
    Cout = w_hwio.shape[-1]
    Hp, Wp = H + 2, W + 2
    S = Hp * Wp                               # padded lanes per sample
    max_off = 2 * Wp + 2                      # largest tap shift (ky=kx=2)
    n_out = _round_up(Bc * S, 128)            # lane-dense output width / chunk
    n_pad = _round_up(n_out + max_off, 128)   # input lanes incl. shift slack

    # One pad + layout pass over the RAW activations (no 9x im2col expansion);
    # bf16 halves the streamed HBM bytes.  Padding zeros implement the conv's
    # "same" padding inside the flattened-lane layout.
    xp = jnp.pad(x, ((0, 0), (0, 0), (1, 1), (1, 1)))            # (B,Cin,Hp,Wp)
    xf = xp.reshape(degree, Bc, Cin, S).transpose(0, 2, 1, 3)    # (deg,Cin,Bc,S)
    xf = xf.reshape(degree, Cin, Bc * S)
    xf = jnp.pad(xf, ((0, 0), (0, 0), (0, n_pad - Bc * S)))
    xf = xf.astype(jnp.bfloat16)

    # Per-tap weight matrices (tap t = ky*3 + kx), resident across the grid.
    w_taps = w_hwio.reshape(9, Cin, Cout).transpose(0, 2, 1).astype(jnp.bfloat16)
    b2d = bias.reshape(Cout, 1).astype(jnp.float32)

    kernel = functools.partial(_conv3x3_relu_chunk_kernel, wp=Wp, n_out=n_out)

    flops = 2 * degree * Cout * 9 * Cin * n_out
    bytes_accessed = (xf.size * 2 + w_taps.size * 2 + b2d.size * 4
                      + Cout * n_out * 4)

    out = pl.pallas_call(
        kernel,
        out_shape=jax.ShapeDtypeStruct((Cout, n_out), jnp.float32),
        grid=(degree,),
        in_specs=[
            pl.BlockSpec((1, Cin, n_pad), lambda c: (c, 0, 0)),
            pl.BlockSpec((9, Cout, Cin), lambda c: (0, 0, 0)),
            pl.BlockSpec((Cout, 1), lambda c: (0, 0)),
        ],
        # Constant output index_map: the (Cout, n_out) block stays resident in
        # VMEM across all chunks and only the LAST chunk's result is written
        # back to HBM (last write wins) -- the non-final chunks are computed
        # (as in the torch module) but never materialized.  This requires the
        # chunk axis to be "arbitrary"; at realistic sizes a "parallel"
        # lane-tile axis would be added to keep v7x's 2 TCs busy.
        out_specs=pl.BlockSpec((Cout, n_out), lambda c: (0, 0)),
        compiler_params=pltpu.CompilerParams(
            dimension_semantics=("arbitrary",),
        ),
        cost_estimate=pl.CostEstimate(flops=flops, transcendentals=0,
                                      bytes_accessed=bytes_accessed),
    )(xf, w_taps, b2d)

    # Decode only the returned (tiny) chunk: lane l = b*Hp*Wp + h*Wp + w, keep
    # h < H, w < W.  Fuses into a single small XLA slice/transpose.
    last = out[:, :Bc * S].reshape(Cout, Bc, Hp, Wp)[:, :, :H, :W]
    return last.transpose(1, 0, 2, 3)                 # (Bc, Cout, H, W)


# ------------------------------------ main ------------------------------------
if __name__ == "__main__":
    key = jax.random.PRNGKey(0)
    k_x, k_w, k_b = jax.random.split(key, 3)

    B, Cin, H, W = 4, 4, 16, 16   # batch divisible by degree=2
    Cout = 8
    degree = 2

    x = jax.random.normal(k_x, (B, Cin, H, W), dtype=jnp.float32)
    # Deterministic "model" parameters (Conv2d(Cin, Cout, 3, padding=1)).
    w_hwio = 0.1 * jax.random.normal(k_w, (3, 3, Cin, Cout), dtype=jnp.float32)
    bias = 0.1 * jax.random.normal(k_b, (Cout,), dtype=jnp.float32)

    fwd = jax.jit(functools.partial(async_pipeline_forward, degree=degree))
    out = jax.block_until_ready(fwd(x, w_hwio, bias))

    # Sanity: forward returns only the LAST chunk's output.
    assert out.shape == (B // degree, Cout, H, W), out.shape

    # Reference: wrapped model (conv + bias + ReLU) applied to the last chunk,
    # using the same bf16 input/weight rounding the kernel streams (f32 acc).
    xb = x.astype(jnp.bfloat16).astype(jnp.float32)
    wb = w_hwio.astype(jnp.bfloat16).astype(jnp.float32)
    last_chunk = xb[B - B // degree:]
    ref = lax.conv_general_dilated(
        last_chunk, wb, window_strides=(1, 1), padding="SAME",
        dimension_numbers=("NCHW", "HWIO", "NCHW"),
        preferred_element_type=jnp.float32)
    ref = jnp.maximum(ref + bias[None, :, None, None], 0.0)
    err = float(jnp.max(jnp.abs(out - ref)))
    assert jnp.allclose(out, ref, atol=1e-3, rtol=1e-3), err

    print("KERNEL_OK")
</pallas_src>

<mosaic_0001>
module attributes {stable_mosaic.version = 11 : i64} {
  func.func @_conv3x3_relu_chunk_kernel(%arg0: i32, %arg1: memref<1x4x896xbf16, #tpu.memory_space<vmem>>, %arg2: memref<9x8x4xbf16, #tpu.memory_space<vmem>>, %arg3: memref<8x1xf32, #tpu.memory_space<vmem>>, %arg4: memref<8x768xf32, #tpu.memory_space<vmem>>) attributes {dimension_semantics = [#tpu.dimension_semantics<arbitrary>], iteration_bounds = array<i64: 2>, scalar_prefetch = 0 : i64, scratch_operands = 0 : i64, tpu.core_type = #tpu.core_type<tc>, window_params = [{transform_indices = @transform_0, window_bounds = array<i64: 1, 4, 896>}, {pipeline_mode = #tpu.pipeline_mode<synchronous>, transform_indices = @transform_1, window_bounds = array<i64: 9, 8, 4>}, {pipeline_mode = #tpu.pipeline_mode<synchronous>, transform_indices = @transform_2, window_bounds = array<i64: 8, 1>}, {pipeline_mode = #tpu.pipeline_mode<synchronous>, transform_indices = @transform_3, window_bounds = array<i64: 8, 768>}]} {
    %c0 = arith.constant 0 : index
    %c0_0 = arith.constant 0 : index
    %c0_1 = arith.constant 0 : index
    %0 = vector.load %arg2[%c0, %c0_0, %c0_1] : memref<9x8x4xbf16, #tpu.memory_space<vmem>>, vector<1x8x4xbf16>
    %1 = vector.shape_cast %0 : vector<1x8x4xbf16> to vector<8x4xbf16>
    %c0_2 = arith.constant 0 : index
    %c0_3 = arith.constant 0 : index
    %c0_4 = arith.constant 0 : index
    %2 = vector.load %arg1[%c0_2, %c0_3, %c0_4] : memref<1x4x896xbf16, #tpu.memory_space<vmem>>, vector<1x4x768xbf16>
    %3 = vector.shape_cast %2 : vector<1x4x768xbf16> to vector<4x768xbf16>
    %cst = arith.constant dense<0.000000e+00> : vector<8x768xf32>
    %4 = tpu.matmul %1, %3, %cst {dimension_numbers = #tpu.dot_dimension_numbers<[1], [0], [0], [1], [0, 0, 1, 1], [], []>} : vector<8x4xbf16>, vector<4x768xbf16>, vector<8x768xf32> -> vector<8x768xf32>
    %c1 = arith.constant 1 : index
    %c0_5 = arith.constant 0 : index
    %c0_6 = arith.constant 0 : index
    %5 = vector.load %arg2[%c1, %c0_5, %c0_6] : memref<9x8x4xbf16, #tpu.memory_space<vmem>>, vector<1x8x4xbf16>
    %6 = vector.shape_cast %5 : vector<1x8x4xbf16> to vector<8x4xbf16>
    %c0_7 = arith.constant 0 : index
    %c0_8 = arith.constant 0 : index
    %c1_9 = arith.constant 1 : index
    %7 = vector.load %arg1[%c0_7, %c0_8, %c1_9] : memref<1x4x896xbf16, #tpu.memory_space<vmem>>, vector<1x4x768xbf16>
    %8 = vector.shape_cast %7 : vector<1x4x768xbf16> to vector<4x768xbf16>
    %cst_10 = arith.constant dense<0.000000e+00> : vector<8x768xf32>
    %9 = tpu.matmul %6, %8, %cst_10 {dimension_numbers = #tpu.dot_dimension_numbers<[1], [0], [0], [1], [0, 0, 1, 1], [], []>} : vector<8x4xbf16>, vector<4x768xbf16>, vector<8x768xf32> -> vector<8x768xf32>
    %10 = arith.addf %4, %9 : vector<8x768xf32>
    %c2 = arith.constant 2 : index
    %c0_11 = arith.constant 0 : index
    %c0_12 = arith.constant 0 : index
    %11 = vector.load %arg2[%c2, %c0_11, %c0_12] : memref<9x8x4xbf16, #tpu.memory_space<vmem>>, vector<1x8x4xbf16>
    %12 = vector.shape_cast %11 : vector<1x8x4xbf16> to vector<8x4xbf16>
    %c0_13 = arith.constant 0 : index
    %c0_14 = arith.constant 0 : index
    %c2_15 = arith.constant 2 : index
    %13 = vector.load %arg1[%c0_13, %c0_14, %c2_15] : memref<1x4x896xbf16, #tpu.memory_space<vmem>>, vector<1x4x768xbf16>
    %14 = vector.shape_cast %13 : vector<1x4x768xbf16> to vector<4x768xbf16>
    %cst_16 = arith.constant dense<0.000000e+00> : vector<8x768xf32>
    %15 = tpu.matmul %12, %14, %cst_16 {dimension_numbers = #tpu.dot_dimension_numbers<[1], [0], [0], [1], [0, 0, 1, 1], [], []>} : vector<8x4xbf16>, vector<4x768xbf16>, vector<8x768xf32> -> vector<8x768xf32>
    %16 = arith.addf %10, %15 : vector<8x768xf32>
    %c3 = arith.constant 3 : index
    %c0_17 = arith.constant 0 : index
    %c0_18 = arith.constant 0 : index
    %17 = vector.load %arg2[%c3, %c0_17, %c0_18] : memref<9x8x4xbf16, #tpu.memory_space<vmem>>, vector<1x8x4xbf16>
    %18 = vector.shape_cast %17 : vector<1x8x4xbf16> to vector<8x4xbf16>
    %c0_19 = arith.constant 0 : index
    %c0_20 = arith.constant 0 : index
    %c18 = arith.constant 18 : index
    %19 = vector.load %arg1[%c0_19, %c0_20, %c18] : memref<1x4x896xbf16, #tpu.memory_space<vmem>>, vector<1x4x768xbf16>
    %20 = vector.shape_cast %19 : vector<1x4x768xbf16> to vector<4x768xbf16>
    %cst_21 = arith.constant dense<0.000000e+00> : vector<8x768xf32>
    %21 = tpu.matmul %18, %20, %cst_21 {dimension_numbers = #tpu.dot_dimension_numbers<[1], [0], [0], [1], [0, 0, 1, 1], [], []>} : vector<8x4xbf16>, vector<4x768xbf16>, vector<8x768xf32> -> vector<8x768xf32>
    %22 = arith.addf %16, %21 : vector<8x768xf32>
    %c4 = arith.constant 4 : index
    %c0_22 = arith.constant 0 : index
    %c0_23 = arith.constant 0 : index
    %23 = vector.load %arg2[%c4, %c0_22, %c0_23] : memref<9x8x4xbf16, #tpu.memory_space<vmem>>, vector<1x8x4xbf16>
    %24 = vector.shape_cast %23 : vector<1x8x4xbf16> to vector<8x4xbf16>
    %c0_24 = arith.constant 0 : index
    %c0_25 = arith.constant 0 : index
    %c19 = arith.constant 19 : index
    %25 = vector.load %arg1[%c0_24, %c0_25, %c19] : memref<1x4x896xbf16, #tpu.memory_space<vmem>>, vector<1x4x768xbf16>
    %26 = vector.shape_cast %25 : vector<1x4x768xbf16> to vector<4x768xbf16>
    %cst_26 = arith.constant dense<0.000000e+00> : vector<8x768xf32>
    %27 = tpu.matmul %24, %26, %cst_26 {dimension_numbers = #tpu.dot_dimension_numbers<[1], [0], [0], [1], [0, 0, 1, 1], [], []>} : vector<8x4xbf16>, vector<4x768xbf16>, vector<8x768xf32> -> vector<8x768xf32>
    %28 = arith.addf %22, %27 : vector<8x768xf32>
    %c5 = arith.constant 5 : index
    %c0_27 = arith.constant 0 : index
    %c0_28 = arith.constant 0 : index
    %29 = vector.load %arg2[%c5, %c0_27, %c0_28] : memref<9x8x4xbf16, #tpu.memory_space<vmem>>, vector<1x8x4xbf16>
    %30 = vector.shape_cast %29 : vector<1x8x4xbf16> to vector<8x4xbf16>
    %c0_29 = arith.constant 0 : index
    %c0_30 = arith.constant 0 : index
    %c20 = arith.constant 20 : index
    %31 = vector.load %arg1[%c0_29, %c0_30, %c20] : memref<1x4x896xbf16, #tpu.memory_space<vmem>>, vector<1x4x768xbf16>
    %32 = vector.shape_cast %31 : vector<1x4x768xbf16> to vector<4x768xbf16>
    %cst_31 = arith.constant dense<0.000000e+00> : vector<8x768xf32>
    %33 = tpu.matmul %30, %32, %cst_31 {dimension_numbers = #tpu.dot_dimension_numbers<[1], [0], [0], [1], [0, 0, 1, 1], [], []>} : vector<8x4xbf16>, vector<4x768xbf16>, vector<8x768xf32> -> vector<8x768xf32>
    %34 = arith.addf %28, %33 : vector<8x768xf32>
    %c6 = arith.constant 6 : index
    %c0_32 = arith.constant 0 : index
    %c0_33 = arith.constant 0 : index
    %35 = vector.load %arg2[%c6, %c0_32, %c0_33] : memref<9x8x4xbf16, #tpu.memory_space<vmem>>, vector<1x8x4xbf16>
    %36 = vector.shape_cast %35 : vector<1x8x4xbf16> to vector<8x4xbf16>
    %c0_34 = arith.constant 0 : index
    %c0_35 = arith.constant 0 : index
    %c36 = arith.constant 36 : index
    %37 = vector.load %arg1[%c0_34, %c0_35, %c36] : memref<1x4x896xbf16, #tpu.memory_space<vmem>>, vector<1x4x768xbf16>
    %38 = vector.shape_cast %37 : vector<1x4x768xbf16> to vector<4x768xbf16>
    %cst_36 = arith.constant dense<0.000000e+00> : vector<8x768xf32>
    %39 = tpu.matmul %36, %38, %cst_36 {dimension_numbers = #tpu.dot_dimension_numbers<[1], [0], [0], [1], [0, 0, 1, 1], [], []>} : vector<8x4xbf16>, vector<4x768xbf16>, vector<8x768xf32> -> vector<8x768xf32>
    %40 = arith.addf %34, %39 : vector<8x768xf32>
    %c7 = arith.constant 7 : index
    %c0_37 = arith.constant 0 : index
    %c0_38 = arith.constant 0 : index
    %41 = vector.load %arg2[%c7, %c0_37, %c0_38] : memref<9x8x4xbf16, #tpu.memory_space<vmem>>, vector<1x8x4xbf16>
    %42 = vector.shape_cast %41 : vector<1x8x4xbf16> to vector<8x4xbf16>
    %c0_39 = arith.constant 0 : index
    %c0_40 = arith.constant 0 : index
    %c37 = arith.constant 37 : index
    %43 = vector.load %arg1[%c0_39, %c0_40, %c37] : memref<1x4x896xbf16, #tpu.memory_space<vmem>>, vector<1x4x768xbf16>
    %44 = vector.shape_cast %43 : vector<1x4x768xbf16> to vector<4x768xbf16>
    %cst_41 = arith.constant dense<0.000000e+00> : vector<8x768xf32>
    %45 = tpu.matmul %42, %44, %cst_41 {dimension_numbers = #tpu.dot_dimension_numbers<[1], [0], [0], [1], [0, 0, 1, 1], [], []>} : vector<8x4xbf16>, vector<4x768xbf16>, vector<8x768xf32> -> vector<8x768xf32>
    %46 = arith.addf %40, %45 : vector<8x768xf32>
    %c8 = arith.constant 8 : index
    %c0_42 = arith.constant 0 : index
    %c0_43 = arith.constant 0 : index
    %47 = vector.load %arg2[%c8, %c0_42, %c0_43] : memref<9x8x4xbf16, #tpu.memory_space<vmem>>, vector<1x8x4xbf16>
    %48 = vector.shape_cast %47 : vector<1x8x4xbf16> to vector<8x4xbf16>
    %c0_44 = arith.constant 0 : index
    %c0_45 = arith.constant 0 : index
    %c38 = arith.constant 38 : index
    %49 = vector.load %arg1[%c0_44, %c0_45, %c38] : memref<1x4x896xbf16, #tpu.memory_space<vmem>>, vector<1x4x768xbf16>
    %50 = vector.shape_cast %49 : vector<1x4x768xbf16> to vector<4x768xbf16>
    %cst_46 = arith.constant dense<0.000000e+00> : vector<8x768xf32>
    %51 = tpu.matmul %48, %50, %cst_46 {dimension_numbers = #tpu.dot_dimension_numbers<[1], [0], [0], [1], [0, 0, 1, 1], [], []>} : vector<8x4xbf16>, vector<4x768xbf16>, vector<8x768xf32> -> vector<8x768xf32>
    %52 = arith.addf %46, %51 : vector<8x768xf32>
    %c0_47 = arith.constant 0 : index
    %c0_48 = arith.constant 0 : index
    %53 = vector.load %arg3[%c0_47, %c0_48] : memref<8x1xf32, #tpu.memory_space<vmem>>, vector<8x1xf32>
    %54 = vector.broadcast %53 : vector<8x1xf32> to vector<8x768xf32>
    %55 = arith.addf %52, %54 : vector<8x768xf32>
    %cst_49 = arith.constant 0.000000e+00 : f32
    %56 = vector.broadcast %cst_49 : f32 to vector<8x768xf32>
    %57 = arith.maximumf %55, %56 : vector<8x768xf32>
    %c0_50 = arith.constant 0 : index
    %c0_51 = arith.constant 0 : index
    %58 = vector.load %arg4[%c0_50, %c0_51] : memref<8x768xf32, #tpu.memory_space<vmem>>, vector<8x768xf32>
    tpu.vector_store %arg4[%c0_50, %c0_51], %57 {strides = array<i32>} : memref<8x768xf32, #tpu.memory_space<vmem>>, vector<8x768xf32>,
    return
  }
  func.func @transform_0(%arg0: i32) -> (i32, i32, i32) {
    %c0_i32 = arith.constant 0 : i32
    %c0_i32_0 = arith.constant 0 : i32
    %c0_i32_1 = arith.constant 0 : i32
    return %arg0, %c0_i32, %c0_i32_0 : i32, i32, i32
  }
  func.func @transform_1(%arg0: i32) -> (i32, i32, i32) {
    %c0_i32 = arith.constant 0 : i32
    %c0_i32_0 = arith.constant 0 : i32
    %c0_i32_1 = arith.constant 0 : i32
    %c0_i32_2 = arith.constant 0 : i32
    return %c0_i32, %c0_i32_0, %c0_i32_1 : i32, i32, i32
  }
  func.func @transform_2(%arg0: i32) -> (i32, i32) {
    %c0_i32 = arith.constant 0 : i32
    %c0_i32_0 = arith.constant 0 : i32
    %c0_i32_1 = arith.constant 0 : i32
    return %c0_i32, %c0_i32_0 : i32, i32
  }
  func.func @transform_3(%arg0: i32) -> (i32, i32) {
    %c0_i32 = arith.constant 0 : i32
    %c0_i32_0 = arith.constant 0 : i32
    %c0_i32_1 = arith.constant 0 : i32
    return %c0_i32, %c0_i32_0 : i32, i32
  }
}

</mosaic_0001>

<bundles_post_ra>
// kernel: async_pipeline_forward.1
= control target key start
LH: loop header
LB: loop body
LE: loop exit
PB: predicated region body
PF: predicated region fallthrough
CT: control target
= control target key end

     0   :  { %s2196_s12 = smov 0   ;;  %s2526_s0 = inlined_call_operand.vmem [shape: bf16[2,4,896], index: 0, kind: input, shape index: {}]   ;;  %s2527_s1 = inlined_call_operand.vmem [shape: bf16[9,8,4], index: 1, kind: input, shape index: {}]   ;;  %s2528_s2 = inlined_call_operand.vmem [shape: f32[8,1], index: 2, kind: input, shape index: {}]   ;;  %s2529_s3 = inlined_call_operand.vmem [shape: f32[8,768], index: 3, kind: output, shape index: {}]  }
   0x1 LB: > { %s2059_s13 = sadd.s32 4294967295, %s2164_s12   ;;  %p2062_p0 = scmp.ge.s32.totalorder %s2164_s12, 1  ;;  %s2164_s12 = sphi %s2196_s12, %s13_s12  }
   0x2   : > { %p132_p1 = scmp.lt.s32.totalorder %s2164_s12, 3 }
   0x4   : > { %p133_p2 = pnand %p2062_p0, %p132_p1 }
   0x5   : > { %p151_p3 = scmp.lt.s32.totalorder (!%p133_p2), %s2059_s13, 1  ;;  %v170_v0 = vlaneseq (!%p133_p2)  ;;  %v2166_v1 = vmov (!%p133_p2), 1983009808   ;;  %v2167_v6 = vmov (!%p133_p2), 0   ;;  %s2168_s18 = smov (!%p133_p2), 126   ;;  %v2007_v53 = vld [vmem:[%s2528_s2] sm:$0xff] (!%p133_p2) }
   0x6   : > { %136 = sbr.rel (%p133_p2) target bundleno = 468 (0x1d4), region = 32  ;;  %v168_v2 = vunpack.c.l.s4 (!%p133_p2), %v2166_v1  ;;  %275 = vmatprep.mubr.bf16.mxu0 (!%p133_p2), %v2167_v6  ;;  %316 = vmatprep.mubr.bf16.mxu1 (!%p133_p2), %v2167_v6  ;;  %s2169_s19 = smov (!%p133_p2), 127   ;;  %vm213_vm0 = vcmask (!%p133_p2), 1039360   ;;  %vm224_vm1 = vcmask (!%p133_p2), 1041408   ;;  %v2064_v61 = vld [vmem:[%s2527_s1 + $0x4] sm:$0xf] (!%p133_p2) }
   0x7   : > { %v171_v3 = vshrl.u32 (!%p133_p2), %v170_v0, 7  ;;  %2148 = vset.pattern.permute.xlu0 (!%p133_p2), %v2167_v6  ;;  %s2170_s20 = smov (!%p133_p2), 110   ;;  %s2171_s21 = smov (!%p133_p2), 109   ;;  %vm220_vm2 = vcmask (!%p133_p2), 31744   ;;  %vm590_vm3 = vcmask (!%p133_p2), 1031168   ;;  %vm800_vm4 = vcmask (!%p133_p2), 900096  }
   0x8   : > { %v169_v4 = vunpack.c.0.s8 (!%p133_p2), %v168_v2  ;;  %s2172_s22 = smov (!%p133_p2), 108   ;;  %s2173_s23 = smov (!%p133_p2), 92   ;;  %vm1010_vm5 = vcmask (!%p133_p2), 891904   ;;  %vm1220_vm6 = vcmask (!%p133_p2), 883712   ;;  %vm1430_vm7 = vcmask (!%p133_p2), 752640  }
   0x9   : > { %s2174_s24 = smov (!%p133_p2), 91   ;;  %s2175_s25 = smov (!%p133_p2), 90   ;;  %vm1640_vm8 = vcmask (!%p133_p2), 744448   ;;  %vm1850_vm9 = vcmask (!%p133_p2), 736256  }
   0xa   : > { %v2204_v5 = vsub.s32 (!%p133_p2), %v169_v4, %v171_v3 }
   0xd   : > { %s2531_s13 = smov (!%p151_p3, %s2059_s13), 1 }
   0xe   : > { %s2129_s14 = smul.u32 14, %s2531_s13 }
  0x10   : > { %s2211_s17 = scalar_lea.vmem %s2526_s0, %s2129_s14 }
  0x11   : > { %v539_v7 = vld [vmem:[%s2211_s17] sm:$0xff]  ;;  %v163_v8 = vld [vmem:[%s2211_s17 + $0x8] sm:$0x3f] }
  0x12   : > { %v2217_v9 = vrot.slane %v539_v7, %v2204_v5  ;;  %v543_v10 = vcombine.high %v539_v7, %v539_v7  ;;  %v190_v13 = vrot.slane %v163_v8, %v2204_v5  ;;  %v1380_v14 = vld [vmem:[%s2211_s17 + $0x8] sm:$0x3f]  ;;  %v183_v16 = vcombine.high %v163_v8, %v163_v8 }
  0x13   : > { %v1590_v15 = vld [vmem:[%s2211_s17 + $0x8] sm:$0x3f]  ;;  %v2236_v19 = vrot.slane %v1380_v14, %v2204_v5  ;;  %v1400_v20 = vcombine.high %v1380_v14, %v1380_v14 }
  0x14   : > { %576 = vrot.lane.b32.xlu1 %v2217_v9, %s2168_s18  ;;  %v2223_v11 = vcombine.high %v2217_v9, %v2217_v9  ;;  %199 = vrot.lane.b32.xlu0 %v2217_v9, %s2169_s19  ;;  %v2227_v12 = vrot.slane %v543_v10, %v2204_v5  ;;  %v1800_v17 = vld [vmem:[%s2211_s17 + $0x8] sm:$0x3f]  ;;  %v198_v18 = vcombine.high %v190_v13, %v190_v13 }
  0x15   : > { %v2239_v21 = vrot.slane %v1590_v15, %v2204_v5  ;;  %v2242_v22 = vrot.slane %v1400_v20, %v2204_v5  ;;  %v1610_v23 = vcombine.high %v1590_v15, %v1590_v15  ;;  %v2245_v24 = vrot.slane %v1800_v17, %v2204_v5  ;;  %v540_v30 = vld [vmem:[%s2211_s17 + $0x8] sm:$0x3f] }
  0x16   : > { %v1820_v25 = vcombine.high %v1800_v17, %v1800_v17  ;;  %v197_v26 = vrot.slane %v183_v16, %v2204_v5  ;;  %v2250_v27 = vcombine.high %v2227_v12, %v2227_v12  ;;  %v567_v31 = vrot.slane %v540_v30, %v2204_v5  ;;  %v750_v35 = vld [vmem:[%s2211_s17 + $0x8] sm:$0x3f] }
  0x17   : > { %v2253_v28 = vrot.slane %v1610_v23, %v2204_v5  ;;  %v560_v32 = vcombine.high %v540_v30, %v540_v30  ;;  %v777_v36 = vrot.slane %v750_v35, %v2204_v5  ;;  %v770_v38 = vcombine.high %v750_v35, %v750_v35  ;;  %v960_v40 = vld [vmem:[%s2211_s17 + $0x8] sm:$0x3f] }
  0x18   : > { %201 = vrot.lane.b32.xlu0 %v2223_v11, %s2169_s19  ;;  %203 = vrot.lane.b32.xlu1 %v2227_v12, %s2169_s19  ;;  %v2256_v29 = vrot.slane %v1820_v25, %v2204_v5  ;;  %v575_v33 = vcombine.high %v567_v31, %v567_v31  ;;  %v987_v41 = vrot.slane %v960_v40, %v2204_v5  ;;  %v1170_v45 = vld [vmem:[%s2211_s17 + $0x8] sm:$0x3f]  ;;  %v403_v15 = vsel %vm224_vm1, %v2227_v12, 0 }
  0x19   : > { %v574_v34 = vrot.slane %v560_v32, %v2204_v5  ;;  %v785_v37 = vcombine.high %v777_v36, %v777_v36  ;;  %v784_v39 = vrot.slane %v770_v38, %v2204_v5  ;;  %v980_v42 = vcombine.high %v960_v40, %v960_v40  ;;  %v2071_v10 = vld.sshfl [vmem:[%s2211_s17 + $0x8] sm:$0x33 pattern:$0x76325410] }
  0x1a   : > { %v995_v43 = vcombine.high %v987_v41, %v987_v41  ;;  %v1197_v46 = vrot.slane %v1170_v45, %v2204_v5  ;;  %v1190_v48 = vcombine.high %v1170_v45, %v1170_v45  ;;  %v1415_v50 = vcombine.high %v2236_v19, %v2236_v19  ;;  %v2078_v30 = vld [vmem:[%s2527_s1 + $0x8] sm:$0xf] }
  0x1b   : > { %v994_v44 = vrot.slane %v980_v42, %v2204_v5  ;;  %v1625_v51 = vcombine.high %v2239_v21, %v2239_v21  ;;  %v1835_v52 = vcombine.high %v2245_v24, %v2245_v24  ;;  %v397_v16 = vsel %vm224_vm1, %v2217_v9, 0 }
  0x1c   : > { %207 = vrot.lane.b32.xlu0 %v190_v13, %s2169_s19  ;;  %209 = vrot.lane.b32.xlu1 %v198_v18, %s2169_s19  ;;  %v1205_v47 = vcombine.high %v1197_v46, %v1197_v46  ;;  %v1204_v49 = vrot.slane %v1190_v48, %v2204_v5  ;;  %v392_v17 = vcombine.high %v2071_v10, %v2071_v10 }
  0x20   : > { %211 = vrot.lane.b32.xlu0 %v197_v26, %s2169_s19  ;;  %205 = vrot.lane.b32.xlu1 %v2250_v27, %s2169_s19 }
  0x24   : > { %578 = vrot.lane.b32.xlu0 %v2223_v11, %s2168_s18  ;;  %580 = vrot.lane.b32.xlu1 %v2227_v12, %s2168_s18 }
  0x28   : > { %582 = vrot.lane.b32.xlu0 %v2250_v27, %s2168_s18  ;;  %584 = vrot.lane.b32.xlu1 %v567_v31, %s2168_s18 }
  0x2c   : > { %586 = vrot.lane.b32.xlu0 %v575_v33, %s2168_s18  ;;  %588 = vrot.lane.b32.xlu1 %v574_v34, %s2168_s18 }
  0x30   : > { %786 = vrot.lane.b32.xlu0 %v2217_v9, %s2170_s20  ;;  %788 = vrot.lane.b32.xlu1 %v2223_v11, %s2170_s20 }
  0x34   : > { %790 = vrot.lane.b32.xlu0 %v2227_v12, %s2170_s20  ;;  %792 = vrot.lane.b32.xlu1 %v2250_v27, %s2170_s20 }
  0x38   : > { %794 = vrot.lane.b32.xlu0 %v777_v36, %s2170_s20  ;;  %796 = vrot.lane.b32.xlu1 %v785_v37, %s2170_s20 }
  0x3c   : > { %798 = vrot.lane.b32.xlu0 %v784_v39, %s2170_s20  ;;  %996 = vrot.lane.b32.xlu1 %v2217_v9, %s2171_s21 }
  0x40   : > { %998 = vrot.lane.b32.xlu0 %v2223_v11, %s2171_s21  ;;  %1000 = vrot.lane.b32.xlu1 %v2227_v12, %s2171_s21 }
  0x44   : > { %1002 = vrot.lane.b32.xlu0 %v2250_v27, %s2171_s21  ;;  %1004 = vrot.lane.b32.xlu1 %v987_v41, %s2171_s21 }
  0x48   : > { %1006 = vrot.lane.b32.xlu0 %v995_v43, %s2171_s21  ;;  %1008 = vrot.lane.b32.xlu1 %v994_v44, %s2171_s21 }
  0x4c   : > { %1206 = vrot.lane.b32.xlu0 %v2217_v9, %s2172_s22  ;;  %1208 = vrot.lane.b32.xlu1 %v2223_v11, %s2172_s22 }
  0x50   : > { %1210 = vrot.lane.b32.xlu0 %v2227_v12, %s2172_s22  ;;  %1212 = vrot.lane.b32.xlu1 %v2250_v27, %s2172_s22 }
  0x54   : > { %1214 = vrot.lane.b32.xlu0 %v1197_v46, %s2172_s22  ;;  %1216 = vrot.lane.b32.xlu1 %v1205_v47, %s2172_s22 }
  0x58   : > { %1218 = vrot.lane.b32.xlu0 %v1204_v49, %s2172_s22  ;;  %1416 = vrot.lane.b32.xlu1 %v2217_v9, %s2173_s23 }
  0x5c   : > { %1418 = vrot.lane.b32.xlu0 %v2223_v11, %s2173_s23  ;;  %1420 = vrot.lane.b32.xlu1 %v2227_v12, %s2173_s23 }
  0x60   : > { %1422 = vrot.lane.b32.xlu0 %v2250_v27, %s2173_s23  ;;  %1424 = vrot.lane.b32.xlu1 %v2236_v19, %s2173_s23 }
  0x64   : > { %1426 = vrot.lane.b32.xlu0 %v1415_v50, %s2173_s23  ;;  %1428 = vrot.lane.b32.xlu1 %v2242_v22, %s2173_s23  ;;  %v409_v22 = vsel %vm224_vm1, %v2071_v10, 0 }
  0x68   : > { %1626 = vrot.lane.b32.xlu0 %v2217_v9, %s2174_s24  ;;  %1628 = vrot.lane.b32.xlu1 %v2223_v11, %s2174_s24 }
  0x6c   : > { %1630 = vrot.lane.b32.xlu0 %v2227_v12, %s2174_s24  ;;  %1632 = vrot.lane.b32.xlu1 %v2250_v27, %s2174_s24 }
  0x70   : > { %1634 = vrot.lane.b32.xlu0 %v2239_v21, %s2174_s24  ;;  %1636 = vrot.lane.b32.xlu1 %v1625_v51, %s2174_s24  ;;  %v2085_v51 = vld [vmem:[%s2527_s1 + $0xc] sm:$0xf] }
  0x74   : > { %1638 = vrot.lane.b32.xlu0 %v2253_v28, %s2174_s24  ;;  %1836 = vrot.lane.b32.xlu1 %v2217_v9, %s2175_s25 }
  0x78   : > { %1838 = vrot.lane.b32.xlu0 %v2223_v11, %s2175_s25  ;;  %1840 = vrot.lane.b32.xlu1 %v2227_v12, %s2175_s25 }
  0x7c   : > { %1842 = vrot.lane.b32.xlu0 %v2250_v27, %s2175_s25  ;;  %1844 = vrot.lane.b32.xlu1 %v2245_v24, %s2175_s25 }
  0x80   : > { %1846 = vrot.lane.b32.xlu0 %v1835_v52, %s2175_s25  ;;  %1848 = vrot.lane.b32.xlu1 %v2256_v29, %s2175_s25 }
  0x84   : > { %2010 = vperm.xlu0 %2148, %v2007_v53  }
  0x86   : > { %v577_v54 = vpop.permute.xlu1 %576  ;;  %v200_v55 = vpop.permute.xlu0 %199 }
  0x8a   : > { %v202_v56 = vpop.permute.xlu0 %201  ;;  %v204_v57 = vpop.permute.xlu1 %203 }
  0x8b   : > { %v215_v58 = vsel %vm213_vm0, %v202_v56, %v204_v57  ;;  %v214_v59 = vsel %vm213_vm0, %v200_v55, %v202_v56 }
  0x8c   : > { %2065 = vmatprep.subr.msk.bf16.mxu0 %vm224_vm1, %v215_v58  ;;  %v226_v60 = vsel %vm224_vm1, %v214_v59, 0 }
  0x8d   : > { %244 = vmatpush1.bf16.msra.mxu0 %v226_v60 }
  0x8e   : > { %v208_v62 = vpop.permute.xlu0 %207  ;;  %v210_v63 = vpop.permute.xlu1 %209 }
  0x8f   : > { %v218_v0 = vsel %vm213_vm0, %v208_v62, %v210_v63 }
  0x90   : > { %2066 = vmatmul.mubr.msk.bf16.vlgmr.msra.gmra.mrb[0].mxu0 %vm220_vm2, %v2064_v61  ;;  %v238_v7 = vsel %vm224_vm1, %v218_v0, 0 }
  0x91   : > { %357 = vmatprep.mubr.bf16.mxu0 %v2167_v6 }
  0x92   : > { %v212_v1 = vpop.permute.xlu0 %211  ;;  %v206_v2 = vpop.permute.xlu1 %205 }
  0x93   : > { %v219_v3 = vsel %vm213_vm0, %v210_v63, %v212_v1  ;;  %v217_v4 = vsel %vm213_vm0, %v206_v2, %v208_v62  ;;  %v216_v5 = vsel %vm213_vm0, %v204_v57, %v206_v2  ;;  %v2092_v62 = vld [vmem:[%s2527_s1 + $0x10] sm:$0xf] }
  0x94   : > { %2067 = vmatprep.subr.msk.bf16.mxu1 %vm224_vm1, %v217_v4  ;;  %2069 = vmatprep.subr.msk.bf16.mxu0 %vm224_vm1, %v219_v3  ;;  %v232_v8 = vsel %vm224_vm1, %v216_v5, 0 }
  0x95   : > { %285 = vmatpush1.bf16.msra.mxu1 %v232_v8  ;;  %326 = vmatpush1.bf16.msra.mxu0 %v238_v7 }
  0x96   : > { %v579_v13 = vpop.permute.xlu0 %578  ;;  %v581_v14 = vpop.permute.xlu1 %580  ;;  %2074 = vmatprep.subr.msk.bf16.mxu0 %vm224_vm1, %v2250_v27  ;;  %2072 = vmatprep.subr.msk.bf16.mxu1 %vm224_vm1, %v2223_v11  ;;  %v157_v11 = vld [vmem:[%s2527_s1] sm:$0xf] }
  0x97   : > { %v592_v18 = vsel %vm590_vm3, %v579_v13, %v581_v14  ;;  %v591_v9 = vsel %vm590_vm3, %v577_v54, %v579_v13 }
  0x98   : > { %2068 = vmatmul.mubr.msk.bf16.vlgmr.msra.gmra.mrb[0].mxu1 %vm220_vm2, %v2064_v61  ;;  %2070 = vmatmul.mubr.msk.bf16.vlgmr.msra.gmra.mrb[4].mxu0 %vm220_vm2, %v2064_v61  ;;  %v601_v24 = vsel %vm224_vm1, %v591_v9, 0  ;;  %v2099_v9 = vld [vmem:[%s2527_s1 + $0x14] sm:$0xf] }
  0x99   : > { %456 = vmatpush1.bf16.msra.mxu0 %v403_v15  ;;  %415 = vmatpush1.bf16.msra.mxu1 %v397_v16 }
  0x9a   : > { %v583_v19 = vpop.permute.xlu0 %582  ;;  %v585_v20 = vpop.permute.xlu1 %584  ;;  %2079 = vmatprep.subr.msk.bf16.mxu0 %vm224_vm1, %v592_v18  ;;  %446 = vmatprep.mubr.bf16.mxu1 %v2167_v6 }
  0x9b   : > { %487 = vmatprep.mubr.bf16.mxu0 %v2167_v6  ;;  %2076 = vmatprep.subr.msk.bf16.mxu1 %vm224_vm1, %v392_v17  ;;  %v594_v25 = vsel %vm590_vm3, %v583_v19, %v585_v20  ;;  %v593_v28 = vsel %vm590_vm3, %v581_v14, %v583_v19 }
  0x9c   : > { %v607_v34 = vsel %vm224_vm1, %v593_v28, 0 }
  0x9e   : > { %v587_v12 = vpop.permute.xlu0 %586  ;;  %v589_v21 = vpop.permute.xlu1 %588 }
  0x9f   : > { %v596_v23 = vsel %vm590_vm3, %v587_v12, %v589_v21  ;;  %v595_v29 = vsel %vm590_vm3, %v585_v20, %v587_v12 }
  0xa0   : > { %2073 = vmatmul.mubr.msk.bf16.vlgmr.msra.gmra.mrb[4].mxu1 %vm220_vm2, %v157_v11  ;;  %2075 = vmatmul.mubr.msk.bf16.vlgmr.msra.gmra.mrb[8].mxu0 %vm220_vm2, %v157_v11  ;;  %v613_v35 = vsel %vm224_vm1, %v595_v29, 0  ;;  %v2106_v29 = vld [vmem:[%s2527_s1 + $0x18] sm:$0xf] }
  0xa1   : > { %497 = vmatpush1.bf16.msra.mxu1 %v409_v22  ;;  %619 = vmatpush1.bf16.msra.mxu0 %v601_v24 }
  0xa2   : > { %2081 = vmatprep.subr.msk.bf16.mxu1 %vm224_vm1, %v594_v25  ;;  %2083 = vmatprep.subr.msk.bf16.mxu0 %vm224_vm1, %v596_v23  ;;  %v787_v26 = vpop.permute.xlu0 %786  ;;  %v789_v27 = vpop.permute.xlu1 %788 }
  0xa3   : > { %528 = vmatprep.mubr.bf16.mxu1 %v2167_v6  ;;  %650 = vmatprep.mubr.bf16.mxu0 %v2167_v6  ;;  %v801_v39 = vsel %vm800_vm4, %v787_v26, %v789_v27 }
  0xa4   : > { %v811_v44 = vsel %vm224_vm1, %v801_v39, 0 }
  0xa6   : > { %v791_v31 = vpop.permute.xlu0 %790  ;;  %v793_v32 = vpop.permute.xlu1 %792 }
  0xa7   : > { %v802_v33 = vsel %vm800_vm4, %v789_v27, %v791_v31  ;;  %v803_v40 = vsel %vm800_vm4, %v791_v31, %v793_v32 }
  0xa8   : > { %2077 = vmatmul.mubr.msk.bf16.vlgmr.msra.gmra.mrb[8].mxu1 %vm220_vm2, %v157_v11  ;;  %2080 = vmatmul.mubr.msk.bf16.vlgmr.msra.gmra.mrb[12].mxu0 %vm220_vm2, %v2078_v30  ;;  %v817_v45 = vsel %vm224_vm1, %v803_v40, 0 }
  0xa9   : > { %660 = vmatpush1.bf16.msra.mxu1 %v607_v34  ;;  %701 = vmatpush1.bf16.msra.mxu0 %v613_v35 }
  0xaa   : > { %2086 = vmatprep.subr.msk.bf16.mxu1 %vm224_vm1, %v802_v33  ;;  %v795_v36 = vpop.permute.xlu0 %794  ;;  %v797_v37 = vpop.permute.xlu1 %796  ;;  %691 = vmatprep.mubr.bf16.mxu1 %v2167_v6 }
  0xab   : > { %v804_v38 = vsel %vm800_vm4, %v793_v32, %v795_v36  ;;  %732 = vmatprep.mubr.bf16.mxu0 %v2167_v6  ;;  %v805_v49 = vsel %vm800_vm4, %v795_v36, %v797_v37 }
  0xac   : > { %2088 = vmatprep.subr.msk.bf16.mxu0 %vm224_vm1, %v804_v38  ;;  %v823_v55 = vsel %vm224_vm1, %v805_v49, 0 }
  0xae   : > { %v799_v41 = vpop.permute.xlu0 %798  ;;  %v997_v42 = vpop.permute.xlu1 %996 }
  0xaf   : > { %v806_v43 = vsel %vm800_vm4, %v797_v37, %v799_v41 }
  0xb0   : > { %2082 = vmatmul.mubr.msk.bf16.vlgmr.msra.gmra.mrb[12].mxu1 %vm220_vm2, %v2078_v30  ;;  %2084 = vmatmul.mubr.msk.bf16.vlgmr.msra.gmra.mrb[16].mxu0 %vm220_vm2, %v2078_v30 }
  0xb1   : > { %829 = vmatpush1.bf16.msra.mxu1 %v811_v44  ;;  %870 = vmatpush1.bf16.msra.mxu0 %v817_v45 }
  0xb2   : > { %2090 = vmatprep.subr.msk.bf16.mxu1 %vm224_vm1, %v806_v43  ;;  %v999_v46 = vpop.permute.xlu0 %998  ;;  %v1001_v47 = vpop.permute.xlu1 %1000  ;;  %860 = vmatprep.mubr.bf16.mxu1 %v2167_v6 }
  0xb3   : > { %v1012_v48 = vsel %vm1010_vm5, %v999_v46, %v1001_v47  ;;  %901 = vmatprep.mubr.bf16.mxu0 %v2167_v6  ;;  %v1011_v50 = vsel %vm1010_vm5, %v997_v42, %v999_v46 }
  0xb4   : > { %2093 = vmatprep.subr.msk.bf16.mxu0 %vm224_vm1, %v1012_v48  ;;  %v1021_v56 = vsel %vm224_vm1, %v1011_v50, 0  ;;  %v2113_v48 = vld [vmem:[%s2527_s1 + $0x1c] sm:$0xf] }
  0xb6   : > { %v1003_v52 = vpop.permute.xlu0 %1002  ;;  %v1005_v53 = vpop.permute.xlu1 %1004 }
  0xb7   : > { %v1014_v54 = vsel %vm1010_vm5, %v1003_v52, %v1005_v53  ;;  %v1013_v60 = vsel %vm1010_vm5, %v1001_v47, %v1003_v52 }
  0xb8   : > { %2087 = vmatmul.mubr.msk.bf16.vlgmr.msra.gmra.mrb[16].mxu1 %vm220_vm2, %v2085_v51  ;;  %2089 = vmatmul.mubr.msk.bf16.vlgmr.msra.gmra.mrb[20].mxu0 %vm220_vm2, %v2085_v51  ;;  %v1027_v1 = vsel %vm224_vm1, %v1013_v60, 0 }
  0xb9   : > { %911 = vmatpush1.bf16.msra.mxu1 %v823_v55  ;;  %1039 = vmatpush1.bf16.msra.mxu0 %v1021_v56 }
  0xba   : > { %2095 = vmatprep.subr.msk.bf16.mxu1 %vm224_vm1, %v1014_v54  ;;  %v1007_v57 = vpop.permute.xlu0 %1006  ;;  %v1009_v58 = vpop.permute.xlu1 %1008  ;;  %942 = vmatprep.mubr.bf16.mxu1 %v2167_v6 }
  0xbb   : > { %v1016_v59 = vsel %vm1010_vm5, %v1007_v57, %v1009_v58  ;;  %1070 = vmatprep.mubr.bf16.mxu0 %v2167_v6  ;;  %v1015_v61 = vsel %vm1010_vm5, %v1005_v53, %v1007_v57 }
  0xbc   : > { %2097 = vmatprep.subr.msk.bf16.mxu0 %vm224_vm1, %v1016_v59  ;;  %v1033_v2 = vsel %vm224_vm1, %v1015_v61, 0  ;;  %v2120_v59 = vld [vmem:[%s2527_s1 + $0x20] sm:$0xf] }
  0xbe   : > { %v1207_v63 = vpop.permute.xlu0 %1206  ;;  %v1209_v0 = vpop.permute.xlu1 %1208 }
  0xbf   : > { %v1221_v7 = vsel %vm1220_vm6, %v1207_v63, %v1209_v0 }
  0xc0   : > { %2091 = vmatmul.mubr.msk.bf16.vlgmr.msra.gmra.mrb[20].mxu1 %vm220_vm2, %v2085_v51  ;;  %2094 = vmatmul.mubr.msk.bf16.vlgmr.msra.gmra.mrb[24].mxu0 %vm220_vm2, %v2092_v62  ;;  %v1231_v15 = vsel %vm224_vm1, %v1221_v7, 0 }
  0xc1   : > { %1080 = vmatpush1.bf16.msra.mxu1 %v1027_v1  ;;  %1121 = vmatpush1.bf16.msra.mxu0 %v1033_v2 }
  0xc2   : > { %v1211_v3 = vpop.permute.xlu0 %1210  ;;  %v1213_v4 = vpop.permute.xlu1 %1212  ;;  %1111 = vmatprep.mubr.bf16.mxu1 %v2167_v6  ;;  %1152 = vmatprep.mubr.bf16.mxu0 %v2167_v6 }
  0xc3   : > { %v1222_v5 = vsel %vm1220_vm6, %v1209_v0, %v1211_v3  ;;  %v1223_v8 = vsel %vm1220_vm6, %v1211_v3, %v1213_v4 }
  0xc4   : > { %2100 = vmatprep.subr.msk.bf16.mxu1 %vm224_vm1, %v1222_v5  ;;  %v1237_v16 = vsel %vm224_vm1, %v1223_v8, 0 }
  0xc6   : > { %v1215_v10 = vpop.permute.xlu0 %1214  ;;  %v1217_v13 = vpop.permute.xlu1 %1216 }
  0xc7   : > { %v1224_v14 = vsel %vm1220_vm6, %v1213_v4, %v1215_v10  ;;  %v1225_v20 = vsel %vm1220_vm6, %v1215_v10, %v1217_v13 }
  0xc8   : > { %2096 = vmatmul.mubr.msk.bf16.vlgmr.msra.gmra.mrb[24].mxu1 %vm220_vm2, %v2092_v62  ;;  %2098 = vmatmul.mubr.msk.bf16.vlgmr.msra.gmra.mrb[28].mxu0 %vm220_vm2, %v2092_v62  ;;  %v1243_v23 = vsel %vm224_vm1, %v1225_v20, 0 }
  0xc9   : > { %1249 = vmatpush1.bf16.msra.mxu1 %v1231_v15  ;;  %2102 = vmatprep.subr.msk.bf16.mxu0 %vm224_vm1, %v1224_v14 }
  0xca   : > { %1290 = vmatpush1.bf16.msra.mxu0 %v1237_v16  ;;  %v1219_v17 = vpop.permute.xlu0 %1218  ;;  %v1417_v18 = vpop.permute.xlu1 %1416  ;;  %1280 = vmatprep.mubr.bf16.mxu1 %v2167_v6 }
  0xcb   : > { %v1226_v19 = vsel %vm1220_vm6, %v1217_v13, %v1219_v17  ;;  %1321 = vmatprep.mubr.bf16.mxu0 %v2167_v6 }
  0xcc   : > { %2104 = vmatprep.subr.msk.bf16.mxu1 %vm224_vm1, %v1226_v19 }
  0xce   : > { %v1419_v11 = vpop.permute.xlu0 %1418  ;;  %v1421_v12 = vpop.permute.xlu1 %1420 }
  0xcf   : > { %v1431_v21 = vsel %vm1430_vm7, %v1417_v18, %v1419_v11  ;;  %v1432_v22 = vsel %vm1430_vm7, %v1419_v11, %v1421_v12 }
  0xd0   : > { %v1441_v24 = vsel %vm224_vm1, %v1431_v21, 0  ;;  %2101 = vmatmul.mubr.msk.bf16.vlgmr.msra.gmra.mrb[28].mxu1 %vm220_vm2, %v2099_v9  ;;  %2103 = vmatmul.mubr.msk.bf16.vlgmr.msra.gmra.mrb[32].mxu0 %vm220_vm2, %v2099_v9 }
  0xd1   : > { %1331 = vmatpush1.bf16.msra.mxu1 %v1243_v23  ;;  %2107 = vmatprep.subr.msk.bf16.mxu0 %vm224_vm1, %v1432_v22 }
  0xd2   : > { %1459 = vmatpush1.bf16.msra.mxu0 %v1441_v24  ;;  %v1423_v25 = vpop.permute.xlu0 %1422  ;;  %v1425_v26 = vpop.permute.xlu1 %1424  ;;  %1362 = vmatprep.mubr.bf16.mxu1 %v2167_v6 }
  0xd3   : > { %v1434_v27 = vsel %vm1430_vm7, %v1423_v25, %v1425_v26  ;;  %1490 = vmatprep.mubr.bf16.mxu0 %v2167_v6  ;;  %v1433_v28 = vsel %vm1430_vm7, %v1421_v12, %v1423_v25 }
  0xd4   : > { %2109 = vmatprep.subr.msk.bf16.mxu1 %vm224_vm1, %v1434_v27  ;;  %v1447_v34 = vsel %vm224_vm1, %v1433_v28, 0 }
  0xd6   : > { %v1427_v30 = vpop.permute.xlu0 %1426  ;;  %v1429_v31 = vpop.permute.xlu1 %1428 }
  0xd7   : > { %v1435_v32 = vsel %vm1430_vm7, %v1425_v26, %v1427_v30  ;;  %v1436_v33 = vsel %vm1430_vm7, %v1427_v30, %v1429_v31 }
  0xd8   : > { %v1453_v35 = vsel %vm224_vm1, %v1435_v32, 0  ;;  %2105 = vmatmul.mubr.msk.bf16.vlgmr.msra.gmra.mrb[32].mxu1 %vm220_vm2, %v2099_v9  ;;  %2108 = vmatmul.mubr.msk.bf16.vlgmr.msra.gmra.mrb[36].mxu0 %vm220_vm2, %v2106_v29 }
  0xd9   : > { %1500 = vmatpush1.bf16.msra.mxu1 %v1447_v34  ;;  %2111 = vmatprep.subr.msk.bf16.mxu0 %vm224_vm1, %v1436_v33 }
  0xda   : > { %1541 = vmatpush1.bf16.msra.mxu0 %v1453_v35  ;;  %v1627_v36 = vpop.permute.xlu0 %1626  ;;  %v1629_v37 = vpop.permute.xlu1 %1628  ;;  %1531 = vmatprep.mubr.bf16.mxu1 %v2167_v6 }
  0xdb   : > { %1572 = vmatprep.mubr.bf16.mxu0 %v2167_v6  ;;  %v1641_v38 = vsel %vm1640_vm8, %v1627_v36, %v1629_v37 }
  0xdc   : > { %v1651_v42 = vsel %vm224_vm1, %v1641_v38, 0 }
  0xde   : > { %v1631_v39 = vpop.permute.xlu0 %1630  ;;  %v1633_v40 = vpop.permute.xlu1 %1632 }
  0xdf   : > { %v1642_v41 = vsel %vm1640_vm8, %v1629_v37, %v1631_v39  ;;  %v1643_v43 = vsel %vm1640_vm8, %v1631_v39, %v1633_v40 }
  0xe0   : > { %2110 = vmatmul.mubr.msk.bf16.vlgmr.msra.gmra.mrb[36].mxu1 %vm220_vm2, %v2106_v29  ;;  %2112 = vmatmul.mubr.msk.bf16.vlgmr.msra.gmra.mrb[40].mxu0 %vm220_vm2, %v2106_v29  ;;  %v1657_v47 = vsel %vm224_vm1, %v1643_v43, 0 }
  0xe1   : > { %2114 = vmatprep.subr.msk.bf16.mxu1 %vm224_vm1, %v1642_v41  ;;  %1700 = vmatprep.mubr.bf16.mxu1 %v2167_v6 }
  0xe2   : > { %1669 = vmatpush1.bf16.msra.mxu1 %v1651_v42  ;;  %v1635_v44 = vpop.permute.xlu0 %1634  ;;  %v1637_v45 = vpop.permute.xlu1 %1636  ;;  %1741 = vmatprep.mubr.bf16.mxu0 %v2167_v6 }
  0xe3   : > { %v1644_v46 = vsel %vm1640_vm8, %v1633_v40, %v1635_v44  ;;  %v1645_v49 = vsel %vm1640_vm8, %v1635_v44, %v1637_v45 }
  0xe4   : > { %2116 = vmatprep.subr.msk.bf16.mxu0 %vm224_vm1, %v1644_v46  ;;  %v1663_v53 = vsel %vm224_vm1, %v1645_v49, 0 }
  0xe5   : > { %1710 = vmatpush1.bf16.msra.mxu0 %v1657_v47 }
  0xe6   : > { %v1639_v50 = vpop.permute.xlu0 %1638  ;;  %v1837_v51 = vpop.permute.xlu1 %1836 }
  0xe7   : > { %v1646_v52 = vsel %vm1640_vm8, %v1637_v45, %v1639_v50 }
  0xe8   : > { %2115 = vmatmul.mubr.msk.bf16.vlgmr.msra.gmra.mrb[40].mxu1 %vm220_vm2, %v2113_v48  ;;  %2117 = vmatmul.mubr.msk.bf16.vlgmr.msra.gmra.mrb[44].mxu0 %vm220_vm2, %v2113_v48 }
  0xe9   : > { %2118 = vmatprep.subr.msk.bf16.mxu1 %vm224_vm1, %v1646_v52  ;;  %1782 = vmatprep.mubr.bf16.mxu1 %v2167_v6 }
  0xea   : > { %1751 = vmatpush1.bf16.msra.mxu1 %v1663_v53  ;;  %v1839_v54 = vpop.permute.xlu0 %1838  ;;  %v1841_v55 = vpop.permute.xlu1 %1840  ;;  %1910 = vmatprep.mubr.bf16.mxu0 %v2167_v6 }
  0xeb   : > { %v1851_v56 = vsel %vm1850_vm9, %v1837_v51, %v1839_v54  ;;  %v1852_v57 = vsel %vm1850_vm9, %v1839_v54, %v1841_v55 }
  0xec   : > { %v1861_v58 = vsel %vm224_vm1, %v1851_v56, 0  ;;  %2121 = vmatprep.subr.msk.bf16.mxu0 %vm224_vm1, %v1852_v57 }
  0xed   : > { %1879 = vmatpush1.bf16.msra.mxu0 %v1861_v58 }
  0xee   : > { %v1843_v60 = vpop.permute.xlu0 %1842  ;;  %v1845_v61 = vpop.permute.xlu1 %1844 }
  0xef   : > { %v1853_v62 = vsel %vm1850_vm9, %v1841_v55, %v1843_v60  ;;  %v1854_v63 = vsel %vm1850_vm9, %v1843_v60, %v1845_v61 }
  0xf0   : > { %v1867_v0 = vsel %vm224_vm1, %v1853_v62, 0  ;;  %2119 = vmatmul.mubr.msk.bf16.vlgmr.msra.gmra.mrb[44].mxu1 %vm220_vm2, %v2113_v48  ;;  %2122 = vmatmul.mubr.msk.bf16.vlgmr.msra.gmra.mrb[48].mxu0 %vm220_vm2, %v2120_v59 }
  0xf1   : > { %2123 = vmatprep.subr.msk.bf16.mxu1 %vm224_vm1, %v1854_v63  ;;  %1951 = vmatprep.mubr.bf16.mxu1 %v2167_v6 }
  0xf2   : > { %1920 = vmatpush1.bf16.msra.mxu1 %v1867_v0  ;;  %v1847_v1 = vpop.permute.xlu0 %1846  ;;  %v1849_v2 = vpop.permute.xlu1 %1848  ;;  %1992 = vmatprep.mubr.bf16.mxu0 %v2167_v6 }
  0xf3   : > { %v1855_v3 = vsel %vm1850_vm9, %v1845_v61, %v1847_v1  ;;  %v1856_v4 = vsel %vm1850_vm9, %v1847_v1, %v1849_v2 }
  0xf4   : > { %v1873_v5 = vsel %vm224_vm1, %v1855_v3, 0  ;;  %2125 = vmatprep.subr.msk.bf16.mxu0 %vm224_vm1, %v1856_v4 }
  0xf5   : > { %1961 = vmatpush1.bf16.msra.mxu0 %v1873_v5 }
  0xf8   : > { %2124 = vmatmul.mubr.msk.bf16.vlgmr.msra.gmra.mrb[48].mxu1 %vm220_vm2, %v2120_v59  ;;  %2126 = vmatmul.mubr.msk.bf16.vlgmr.msra.gmra.mrb[52].mxu0 %vm220_vm2, %v2120_v59 }
 0x163   : > { %v277_v7 = vpop.f32.mrb[0].mxu0 }
 0x164   : > { %v279_v8 = vpop.f32.mrb[1].mxu0 }
 0x165   : > { %v281_v10 = vpop.f32.mrb[2].mxu0 }
 0x166   : > { %v282_v13 = vpop.f32.mrb[3].mxu0 }
 0x16b   : > { %v318_v14 = vpop.f32.mrb[0].mxu1  ;;  %v359_v15 = vpop.f32.mrb[4].mxu0 }
 0x16c   : > { %v320_v6 = vpop.f32.mrb[1].mxu1  ;;  %v361_v16 = vpop.f32.mrb[5].mxu0 }
 0x16d   : > { %v322_v17 = vpop.f32.mrb[2].mxu1  ;;  %v363_v18 = vpop.f32.mrb[6].mxu0 }
 0x16e   : > { %v323_v19 = vpop.f32.mrb[3].mxu1  ;;  %v364_v20 = vpop.f32.mrb[7].mxu0 }
 0x173   : > { %v448_v9 = vpop.f32.mrb[4].mxu1  ;;  %v489_v11 = vpop.f32.mrb[8].mxu0 }
 0x174   : > { %v449_v12 = vadd.f32 %v448_v9, %v277_v7  ;;  %v490_v21 = vadd.f32 %v489_v11, %v318_v14  ;;  %v450_v22 = vpop.f32.mrb[5].mxu1  ;;  %v491_v23 = vpop.f32.mrb[9].mxu0 }
 0x175   : > { %v451_v24 = vadd.f32 %v450_v22, %v279_v8  ;;  %v492_v25 = vadd.f32 %v491_v23, %v320_v6  ;;  %v452_v26 = vpop.f32.mrb[6].mxu1  ;;  %v493_v27 = vpop.f32.mrb[10].mxu0 }
 0x176   : > { %v453_v28 = vpop.f32.mrb[7].mxu1  ;;  %v494_v29 = vpop.f32.mrb[11].mxu0 }
 0x17b   : > { %v530_v30 = vpop.f32.mrb[8].mxu1  ;;  %v652_v31 = vpop.f32.mrb[12].mxu0 }
 0x17c   : > { %v531_v32 = vadd.f32 %v530_v30, %v359_v15  ;;  %v741_v33 = vadd.f32 %v652_v31, %v449_v12  ;;  %v532_v34 = vpop.f32.mrb[9].mxu1  ;;  %v654_v35 = vpop.f32.mrb[13].mxu0 }
 0x17d   : > { %v533_v36 = vadd.f32 %v532_v34, %v361_v16  ;;  %v742_v37 = vadd.f32 %v654_v35, %v451_v24  ;;  %v534_v38 = vpop.f32.mrb[10].mxu1  ;;  %v656_v39 = vpop.f32.mrb[14].mxu0 }
 0x17e   : > { %v535_v40 = vpop.f32.mrb[11].mxu1  ;;  %v657_v41 = vpop.f32.mrb[15].mxu0 }
 0x183   : > { %v693_v42 = vpop.f32.mrb[12].mxu1  ;;  %v734_v43 = vpop.f32.mrb[16].mxu0 }
 0x184   : > { %v743_v44 = vadd.f32 %v693_v42, %v490_v21  ;;  %v745_v45 = vadd.f32 %v734_v43, %v531_v32  ;;  %v695_v46 = vpop.f32.mrb[13].mxu1  ;;  %v736_v47 = vpop.f32.mrb[17].mxu0 }
 0x185   : > { %v744_v48 = vadd.f32 %v695_v46, %v492_v25  ;;  %v746_v49 = vadd.f32 %v736_v47, %v533_v36  ;;  %v697_v50 = vpop.f32.mrb[14].mxu1  ;;  %v738_v51 = vpop.f32.mrb[18].mxu0 }
 0x186   : > { %v698_v52 = vpop.f32.mrb[15].mxu1  ;;  %v739_v53 = vpop.f32.mrb[19].mxu0 }
 0x18b   : > { %v862_v54 = vpop.f32.mrb[16].mxu1  ;;  %v903_v55 = vpop.f32.mrb[20].mxu0 }
 0x18c   : > { %v951_v56 = vadd.f32 %v862_v54, %v741_v33  ;;  %v953_v57 = vadd.f32 %v903_v55, %v743_v44  ;;  %v864_v58 = vpop.f32.mrb[17].mxu1  ;;  %v905_v59 = vpop.f32.mrb[21].mxu0 }
 0x18d   : > { %v952_v60 = vadd.f32 %v864_v58, %v742_v37  ;;  %v954_v61 = vadd.f32 %v905_v59, %v744_v48  ;;  %v866_v62 = vpop.f32.mrb[18].mxu1  ;;  %v907_v63 = vpop.f32.mrb[22].mxu0 }
 0x18e   : > { %v867_v0 = vpop.f32.mrb[19].mxu1  ;;  %v908_v1 = vpop.f32.mrb[23].mxu0 }
 0x193   : > { %v944_v2 = vpop.f32.mrb[20].mxu1  ;;  %v1072_v3 = vpop.f32.mrb[24].mxu0 }
 0x194   : > { %v955_v4 = vadd.f32 %v944_v2, %v745_v45  ;;  %v1161_v5 = vadd.f32 %v1072_v3, %v951_v56  ;;  %v946_v7 = vpop.f32.mrb[21].mxu1  ;;  %v1074_v8 = vpop.f32.mrb[25].mxu0 }
 0x195   : > { %v956_v10 = vadd.f32 %v946_v7, %v746_v49  ;;  %v1162_v13 = vadd.f32 %v1074_v8, %v952_v60  ;;  %v948_v14 = vpop.f32.mrb[22].mxu1  ;;  %v1076_v15 = vpop.f32.mrb[26].mxu0 }
 0x196   : > { %v949_v6 = vpop.f32.mrb[23].mxu1  ;;  %v1077_v16 = vpop.f32.mrb[27].mxu0 }
 0x197   : > { %v2011_v14 = vpop.permute.xlu0 %2010 }
 0x19b   : > { %v1113_v17 = vpop.f32.mrb[24].mxu1  ;;  %v1154_v18 = vpop.f32.mrb[28].mxu0 }
 0x19c   : > { %v1163_v19 = vadd.f32 %v1113_v17, %v953_v57  ;;  %v1165_v20 = vadd.f32 %v1154_v18, %v955_v4  ;;  %v1115_v9 = vpop.f32.mrb[25].mxu1  ;;  %v1156_v11 = vpop.f32.mrb[29].mxu0 }
 0x19d   : > { %v1164_v12 = vadd.f32 %v1115_v9, %v954_v61  ;;  %v1166_v21 = vadd.f32 %v1156_v11, %v956_v10  ;;  %v1117_v22 = vpop.f32.mrb[26].mxu1  ;;  %v1158_v23 = vpop.f32.mrb[30].mxu0 }
 0x19e   : > { %v1118_v24 = vpop.f32.mrb[27].mxu1  ;;  %v1159_v25 = vpop.f32.mrb[31].mxu0 }
 0x1a3   : > { %v1282_v26 = vpop.f32.mrb[28].mxu1  ;;  %v1323_v27 = vpop.f32.mrb[32].mxu0 }
 0x1a4   : > { %v1371_v28 = vadd.f32 %v1282_v26, %v1161_v5  ;;  %v1373_v29 = vadd.f32 %v1323_v27, %v1163_v19  ;;  %v1284_v30 = vpop.f32.mrb[29].mxu1  ;;  %v1325_v31 = vpop.f32.mrb[33].mxu0 }
 0x1a5   : > { %v1372_v32 = vadd.f32 %v1284_v30, %v1162_v13  ;;  %v1374_v33 = vadd.f32 %v1325_v31, %v1164_v12  ;;  %v1286_v34 = vpop.f32.mrb[30].mxu1  ;;  %v1327_v35 = vpop.f32.mrb[34].mxu0 }
 0x1a6   : > { %v1287_v36 = vpop.f32.mrb[31].mxu1  ;;  %v1328_v37 = vpop.f32.mrb[35].mxu0 }
 0x1ab   : > { %v1364_v38 = vpop.f32.mrb[32].mxu1  ;;  %v1492_v39 = vpop.f32.mrb[36].mxu0 }
 0x1ac   : > { %v1375_v40 = vadd.f32 %v1364_v38, %v1165_v20  ;;  %v1581_v41 = vadd.f32 %v1492_v39, %v1371_v28  ;;  %v1366_v42 = vpop.f32.mrb[33].mxu1  ;;  %v1494_v43 = vpop.f32.mrb[37].mxu0 }
 0x1ad   : > { %v1376_v44 = vadd.f32 %v1366_v42, %v1166_v21  ;;  %v1582_v45 = vadd.f32 %v1494_v43, %v1372_v32  ;;  %v1368_v46 = vpop.f32.mrb[34].mxu1  ;;  %v1496_v47 = vpop.f32.mrb[38].mxu0 }
 0x1ae   : > { %v1369_v48 = vpop.f32.mrb[35].mxu1  ;;  %v1497_v49 = vpop.f32.mrb[39].mxu0 }
 0x1b3   : > { %v1533_v50 = vpop.f32.mrb[36].mxu1  ;;  %v1574_v51 = vpop.f32.mrb[40].mxu0 }
 0x1b4   : > { %v1583_v52 = vadd.f32 %v1533_v50, %v1373_v29  ;;  %v1585_v53 = vadd.f32 %v1574_v51, %v1375_v40  ;;  %v1535_v54 = vpop.f32.mrb[37].mxu1  ;;  %v1576_v55 = vpop.f32.mrb[41].mxu0 }
 0x1b5   : > { %v1584_v56 = vadd.f32 %v1535_v54, %v1374_v33  ;;  %v1586_v57 = vadd.f32 %v1576_v55, %v1376_v44  ;;  %v1537_v58 = vpop.f32.mrb[38].mxu1  ;;  %v1578_v59 = vpop.f32.mrb[42].mxu0 }
 0x1b6   : > { %v1538_v60 = vpop.f32.mrb[39].mxu1  ;;  %v1579_v61 = vpop.f32.mrb[43].mxu0 }
 0x1bb   : > { %v1702_v62 = vpop.f32.mrb[40].mxu1  ;;  %v1743_v63 = vpop.f32.mrb[44].mxu0 }
 0x1bc   : > { %v1791_v0 = vadd.f32 %v1702_v62, %v1581_v41  ;;  %v1793_v1 = vadd.f32 %v1743_v63, %v1583_v52  ;;  %v1704_v2 = vpop.f32.mrb[41].mxu1  ;;  %v1745_v3 = vpop.f32.mrb[45].mxu0 }
 0x1bd   : > { %v1792_v4 = vadd.f32 %v1704_v2, %v1582_v45  ;;  %v1794_v5 = vadd.f32 %v1745_v3, %v1584_v56  ;;  %v1706_v7 = vpop.f32.mrb[42].mxu1  ;;  %v1747_v8 = vpop.f32.mrb[46].mxu0 }
 0x1be   : > { %v1707_v10 = vpop.f32.mrb[43].mxu1  ;;  %v1748_v13 = vpop.f32.mrb[47].mxu0 }
 0x1c3   : > { %v1784_v15 = vpop.f32.mrb[44].mxu1  ;;  %v1912_v6 = vpop.f32.mrb[48].mxu0 }
 0x1c4   : > { %v1795_v16 = vadd.f32 %v1784_v15, %v1585_v53  ;;  %v2001_v17 = vadd.f32 %v1912_v6, %v1791_v0  ;;  %v1786_v18 = vpop.f32.mrb[45].mxu1  ;;  %v1914_v19 = vpop.f32.mrb[49].mxu0 }
 0x1c5   : > { %v1796_v20 = vadd.f32 %v1786_v18, %v1586_v57  ;;  %v2002_v9 = vadd.f32 %v1914_v19, %v1792_v4  ;;  %v1788_v11 = vpop.f32.mrb[46].mxu1  ;;  %v1916_v12 = vpop.f32.mrb[50].mxu0 }
 0x1c6   : > { %v2013_v21 = vadd.f32 %v2011_v14, %v2001_v17  ;;  %v1789_v22 = vpop.f32.mrb[47].mxu1  ;;  %v1917_v23 = vpop.f32.mrb[51].mxu0 }
 0x1c7   : > { %v2014_v24 = vadd.f32 %v2011_v14, %v2002_v9 }
 0x1c8   : > { %v2019_v25 = vmax.f32 %v2013_v21, 0.0 }
 0x1c9   : > { %v2020_v26 = vmax.f32 %v2014_v24, 0.0 }
 0x1ca   : > { %2025 = vst [vmem:[%s2529_s3] sm:$0xff] %v2019_v25 }
 0x1cb   : > { %2026 = vst [vmem:[%s2529_s3 + $0x8] sm:$0xff] %v2020_v26  ;;  %v1953_v27 = vpop.f32.mrb[48].mxu1  ;;  %v1994_v28 = vpop.f32.mrb[52].mxu0 }
 0x1cc   : > { %v2003_v29 = vadd.f32 %v1953_v27, %v1793_v1  ;;  %v2005_v30 = vadd.f32 %v1994_v28, %v1795_v16  ;;  %v1955_v31 = vpop.f32.mrb[49].mxu1  ;;  %v1996_v32 = vpop.f32.mrb[53].mxu0 }
 0x1cd   : > { %v2004_v33 = vadd.f32 %v1955_v31, %v1794_v5  ;;  %v2006_v34 = vadd.f32 %v1996_v32, %v1796_v20  ;;  %v1957_v35 = vpop.f32.mrb[50].mxu1  ;;  %v1998_v36 = vpop.f32.mrb[54].mxu0 }
 0x1ce   : > { %v2015_v37 = vadd.f32 %v2011_v14, %v2003_v29  ;;  %v2017_v38 = vadd.f32 %v2011_v14, %v2005_v30  ;;  %v1958_v39 = vpop.f32.mrb[51].mxu1  ;;  %v1999_v40 = vpop.f32.mrb[55].mxu0 }
 0x1cf   : > { %v2016_v41 = vadd.f32 %v2011_v14, %v2004_v33  ;;  %v2018_v42 = vadd.f32 %v2011_v14, %v2006_v34 }
 0x1d0   : > { %v2021_v43 = vmax.f32 %v2015_v37, 0.0  ;;  %v2023_v44 = vmax.f32 %v2017_v38, 0.0 }
 0x1d1   : > { %v2022_v45 = vmax.f32 %v2016_v41, 0.0  ;;  %v2024_v46 = vmax.f32 %v2018_v42, 0.0 }
 0x1d2   : > { %2027 = vst [vmem:[%s2529_s3 + $0x10] sm:$0xff] %v2021_v43  ;;  %2029 = vst [vmem:[%s2529_s3 + $0x20] sm:$0xff] %v2023_v44 }
 0x1d3   : > { %2028 = vst [vmem:[%s2529_s3 + $0x18] sm:$0xff] %v2022_v45  ;;  %2030 = vst [vmem:[%s2529_s3 + $0x28] sm:$0xff] %v2024_v46 }
 0x1d4 PF: > { %s13_s12 = sadd.s32 1, %s2164_s12  }
 0x1d5   : > { %p10_p4 = scmp.ge.s32.totalorder %s13_s12, 4  }
 0x1d7   :  { %12 = sbr.rel (!%p10_p4) target bundleno = 1 (0x1), region = 66 }

</bundles_post_ra>
